<compile_context>
chip_gen: v6e
topology: v6e:2x2x1
jax: 0.10.0
libtpu: 0.0.40
codegen_flags: <defaults>
</compile_context>

<pallas_src>
import functools

import jax
import jax.numpy as jnp
from jax.experimental import pallas as pl
from jax.experimental.pallas import tpu as pltpu

LEAKY_SLOPE = 0.01  # PyTorch F.leaky_relu default negative_slope
LANE = 128          # lane width (feature dims padded to this)


def _round_up(n, m):
    return ((n + m - 1) // m) * m


def _mlp_kernel(x_ref, *refs):
    """Whole MLP on one batch tile.

    refs = (w0, b0, w1, b1, ..., wL, bL, out_ref)
    Weights are [in_pad, out_pad] (pre-transposed vs. nn.Linear), biases [1, out_pad].
    Matmul operands are in the weights' dtype; accumulation / elementwise is f32
    (keeps the v5e VPU path clean even when the MXU operands are bf16).
    """
    out_ref = refs[-1]
    param_refs = refs[:-1]
    n_layers = len(param_refs) // 2

    h = x_ref[...].astype(jnp.float32)
    for i in range(n_layers):
        w = param_refs[2 * i][...]                           # [in_pad, out_pad]
        b = param_refs[2 * i + 1][...].astype(jnp.float32)   # [1, out_pad]
        if i > 0:
            # leaky_relu between layers only (matches NN1.forward).
            # max(h, a*h) == where(h > 0, h, a*h) for 0 < a < 1; one fewer VPU op.
            h = jnp.maximum(h, LEAKY_SLOPE * h)
        h = jnp.dot(h.astype(w.dtype), w, preferred_element_type=jnp.float32) + b
    out_ref[...] = h.astype(out_ref.dtype)


def _vmem_budget_bytes():
    """~75% of physical VMEM: ~48 MiB on v7x (64 MiB/TC), ~96 MiB on v5e/v6e (128 MiB)."""
    try:
        cap = int(pltpu.get_tpu_info().vmem_capacity_bytes)
    except Exception:
        cap = 128 * 2**20
    return (cap * 3) // 4


@functools.partial(jax.jit, static_argnames=("out_size", "block_batch"))
def _nn1_forward_impl(x, flat_params, *, out_size, block_batch):
    batch, in_size = x.shape
    weights = flat_params[0::2]
    biases = flat_params[1::2]
    in_pad = weights[0].shape[0]
    out_pad = weights[-1].shape[1]
    w_dtype = weights[0].dtype

    # Stream x in the matmul-operand dtype when it is sub-32-bit: weights are
    # VMEM-resident, so x/out DMA is the HBM bottleneck and bf16 halves it.
    stream_dtype = w_dtype if jnp.dtype(w_dtype).itemsize < 4 else x.dtype
    sub = 16 if jnp.dtype(stream_dtype).itemsize == 2 else 8  # packed sublane tile

    # Batch tile: round to the sublane packing, and prefer >=2 grid steps so the
    # "parallel" batch axis shards across both TensorCores on v7x.
    tb = _round_up(min(block_batch, batch), sub)
    if batch > sub:
        tb = min(tb, _round_up(pl.cdiv(batch, 2), sub))
    batch_pad = _round_up(batch, tb)
    grid = (batch_pad // tb,)

    x_p = jnp.zeros((batch_pad, in_pad), stream_dtype)
    x_p = x_p.at[:batch, :in_size].set(x.astype(stream_dtype))

    flat_inputs = [x_p]
    in_specs = [pl.BlockSpec((tb, in_pad), lambda i: (i, 0))]
    for w_p, b_p in zip(weights, biases):
        flat_inputs += [w_p, b_p]
        # Constant index_map -> params stay resident in VMEM across grid steps.
        # (Default pipelining still allocates 2 buffers per input; that 2x is
        # charged in the VMEM estimate below.)
        in_specs += [pl.BlockSpec(w_p.shape, lambda i: (0, 0)),
                     pl.BlockSpec(b_p.shape, lambda i: (0, 0))]
    out_spec = pl.BlockSpec((tb, out_pad), lambda i: (i, 0))

    # VMEM footprint: 2x resident params (BlockSpec double-buffer), f32
    # activation ping/pong, double-buffered x/out tiles.
    param_bytes = sum(a.size * a.dtype.itemsize for a in flat_params)
    widest = max([in_pad] + [w.shape[1] for w in weights])
    act_bytes = 2 * tb * widest * 4
    io_bytes = 2 * tb * (in_pad * jnp.dtype(stream_dtype).itemsize
                         + out_pad * x.dtype.itemsize)
    footprint = 2 * param_bytes + act_bytes + io_bytes
    vmem_limit = int(min(_vmem_budget_bytes(),
                         max(32 * 2**20, footprint + footprint // 2)))
    # TODO(synk): add an N-tiled fallback over the widest layer when `footprint`
    # exceeds the v7x budget (very wide hidden layers can't all stay resident).

    out_padded = pl.pallas_call(
        _mlp_kernel,
        out_shape=jax.ShapeDtypeStruct((batch_pad, out_pad), x.dtype),
        grid=grid,
        in_specs=in_specs,
        out_specs=out_spec,
        compiler_params=pltpu.CompilerParams(
            dimension_semantics=("parallel",),
            vmem_limit_bytes=vmem_limit),
    )(*flat_inputs)

    return out_padded[:batch, :out_size]


def prepare_nn1_params(params, *, compute_dtype=jnp.float32):
    """Pad/cast parameters ONCE (hoisted out of the per-call jitted path).

    params: list of (W [in, out], b [out]) per layer.
    Weights are zero-padded to lane multiples and cast to compute_dtype
    (jnp.bfloat16 recommended on v6e/v7x: native MXU rate, half the resident
    VMEM + weight DMA); biases stay f32 [1, out_pad].  Zero padding is exact.
    Returns (flat_padded_params, out_size) to hand to nn1_forward.
    """
    in_size = params[0][0].shape[0]
    out_size = params[-1][0].shape[1]
    prev_pad = _round_up(in_size, LANE)
    flat = []
    for w, b in params:
        fin, fout = w.shape
        fout_pad = _round_up(fout, LANE)
        w_p = jnp.zeros((prev_pad, fout_pad), compute_dtype)
        w_p = w_p.at[:fin, :fout].set(w.astype(compute_dtype))
        b_p = jnp.zeros((1, fout_pad), jnp.float32)
        b_p = b_p.at[0, :fout].set(b.astype(jnp.float32))
        flat += [w_p, b_p]
        prev_pad = fout_pad
    return tuple(flat), out_size


def nn1_forward(x, prepared, *, block_batch=512):
    """x: [batch, inSize]; prepared: output of prepare_nn1_params."""
    flat, out_size = prepared
    return _nn1_forward_impl(x, flat, out_size=out_size, block_batch=block_batch)


def init_nn1_params(key, in_size, out_size, layers):
    """Deterministic init mimicking nn.Linear's U(-1/sqrt(fan_in), 1/sqrt(fan_in)).

    Weights stored as [in, out] (transpose of nn.Linear storage; semantics identical).
    """
    sizes = [in_size] + list(layers) + [out_size]
    params = []
    for i in range(len(sizes) - 1):
        fan_in, fan_out = sizes[i], sizes[i + 1]
        key, kw, kb = jax.random.split(key, 3)
        bound = 1.0 / jnp.sqrt(fan_in)
        w = jax.random.uniform(kw, (fan_in, fan_out), jnp.float32, -bound, bound)
        b = jax.random.uniform(kb, (fan_out,), jnp.float32, -bound, bound)
        params.append((w, b))
    return params


def nn1_reference(x, params):
    """Pure-JAX reference for verification (mirrors NN1.forward)."""
    h = x
    for i, (w, b) in enumerate(params):
        if i > 0:
            h = jnp.where(h > 0, h, LEAKY_SLOPE * h)
        h = h @ w + b
    return h


if __name__ == "__main__":
    key = jax.random.PRNGKey(0)
    batch, in_size, out_size = 8, 16, 4
    hidden_layers = [32, 32]

    key, kx = jax.random.split(key)
    x = jax.random.normal(kx, (batch, in_size), jnp.float32)
    params = init_nn1_params(key, in_size, out_size, hidden_layers)

    ref = nn1_reference(x, params)

    # f32 operand path (bit-exact-ish vs. reference).
    prepared_f32 = prepare_nn1_params(params, compute_dtype=jnp.float32)
    out = jax.block_until_ready(nn1_forward(x, prepared_f32))
    assert out.shape == (batch, out_size)
    assert jnp.allclose(out, ref, atol=1e-5, rtol=1e-5)

    # bf16 MXU-operand path (recommended default on v6e/v7x); looser tolerance.
    prepared_bf16 = prepare_nn1_params(params, compute_dtype=jnp.bfloat16)
    out_bf16 = jax.block_until_ready(nn1_forward(x, prepared_bf16))
    assert out_bf16.shape == (batch, out_size)
    assert jnp.allclose(out_bf16, ref, atol=1e-1, rtol=1e-1)

    print("KERNEL_OK")
</pallas_src>

<mosaic_0001>
module attributes {stable_mosaic.version = 11 : i64} {
  func.func @_mlp_kernel(%arg0: i32, %arg1: memref<8x128xf32, #tpu.memory_space<vmem>>, %arg2: memref<128x128xf32, #tpu.memory_space<vmem>>, %arg3: memref<1x128xf32, #tpu.memory_space<vmem>>, %arg4: memref<128x128xf32, #tpu.memory_space<vmem>>, %arg5: memref<1x128xf32, #tpu.memory_space<vmem>>, %arg6: memref<128x128xf32, #tpu.memory_space<vmem>>, %arg7: memref<1x128xf32, #tpu.memory_space<vmem>>, %arg8: memref<8x128xf32, #tpu.memory_space<vmem>>) attributes {dimension_semantics = [#tpu.dimension_semantics<parallel>], iteration_bounds = array<i64: 1>, scalar_prefetch = 0 : i64, scratch_operands = 0 : i64, tpu.core_type = #tpu.core_type<tc>, window_params = [{transform_indices = @transform_0, window_bounds = array<i64: 8, 128>}, {pipeline_mode = #tpu.pipeline_mode<synchronous>, transform_indices = @transform_1, window_bounds = array<i64: 128, 128>}, {pipeline_mode = #tpu.pipeline_mode<synchronous>, transform_indices = @transform_2, window_bounds = array<i64: 1, 128>}, {pipeline_mode = #tpu.pipeline_mode<synchronous>, transform_indices = @transform_3, window_bounds = array<i64: 128, 128>}, {pipeline_mode = #tpu.pipeline_mode<synchronous>, transform_indices = @transform_4, window_bounds = array<i64: 1, 128>}, {pipeline_mode = #tpu.pipeline_mode<synchronous>, transform_indices = @transform_5, window_bounds = array<i64: 128, 128>}, {pipeline_mode = #tpu.pipeline_mode<synchronous>, transform_indices = @transform_6, window_bounds = array<i64: 1, 128>}, {transform_indices = @transform_7, window_bounds = array<i64: 8, 128>}]} {
    %c0 = arith.constant 0 : index
    %c0_0 = arith.constant 0 : index
    %0 = vector.load %arg1[%c0, %c0_0] : memref<8x128xf32, #tpu.memory_space<vmem>>, vector<8x128xf32>
    %c0_1 = arith.constant 0 : index
    %c0_2 = arith.constant 0 : index
    %1 = vector.load %arg2[%c0_1, %c0_2] : memref<128x128xf32, #tpu.memory_space<vmem>>, vector<128x128xf32>
    %c0_3 = arith.constant 0 : index
    %c0_4 = arith.constant 0 : index
    %2 = vector.load %arg3[%c0_3, %c0_4] : memref<1x128xf32, #tpu.memory_space<vmem>>, vector<1x128xf32>
    %cst = arith.constant dense<0.000000e+00> : vector<8x128xf32>
    %3 = tpu.matmul %0, %1, %cst {dimension_numbers = #tpu.dot_dimension_numbers<[1], [0], [0], [1], [0, 0, 1, 1], [], []>} : vector<8x128xf32>, vector<128x128xf32>, vector<8x128xf32> -> vector<8x128xf32>
    %4 = vector.broadcast %2 : vector<1x128xf32> to vector<8x128xf32>
    %5 = arith.addf %3, %4 : vector<8x128xf32>
    %c0_5 = arith.constant 0 : index
    %c0_6 = arith.constant 0 : index
    %6 = vector.load %arg4[%c0_5, %c0_6] : memref<128x128xf32, #tpu.memory_space<vmem>>, vector<128x128xf32>
    %c0_7 = arith.constant 0 : index
    %c0_8 = arith.constant 0 : index
    %7 = vector.load %arg5[%c0_7, %c0_8] : memref<1x128xf32, #tpu.memory_space<vmem>>, vector<1x128xf32>
    %cst_9 = arith.constant 0.00999999977 : f32
    %8 = vector.broadcast %cst_9 : f32 to vector<8x128xf32>
    %9 = arith.mulf %8, %5 : vector<8x128xf32>
    %10 = arith.maximumf %5, %9 : vector<8x128xf32>
    %cst_10 = arith.constant dense<0.000000e+00> : vector<8x128xf32>
    %11 = tpu.matmul %10, %6, %cst_10 {dimension_numbers = #tpu.dot_dimension_numbers<[1], [0], [0], [1], [0, 0, 1, 1], [], []>} : vector<8x128xf32>, vector<128x128xf32>, vector<8x128xf32> -> vector<8x128xf32>
    %12 = vector.broadcast %7 : vector<1x128xf32> to vector<8x128xf32>
    %13 = arith.addf %11, %12 : vector<8x128xf32>
    %c0_11 = arith.constant 0 : index
    %c0_12 = arith.constant 0 : index
    %14 = vector.load %arg6[%c0_11, %c0_12] : memref<128x128xf32, #tpu.memory_space<vmem>>, vector<128x128xf32>
    %c0_13 = arith.constant 0 : index
    %c0_14 = arith.constant 0 : index
    %15 = vector.load %arg7[%c0_13, %c0_14] : memref<1x128xf32, #tpu.memory_space<vmem>>, vector<1x128xf32>
    %cst_15 = arith.constant 0.00999999977 : f32
    %16 = vector.broadcast %cst_15 : f32 to vector<8x128xf32>
    %17 = arith.mulf %16, %13 : vector<8x128xf32>
    %18 = arith.maximumf %13, %17 : vector<8x128xf32>
    %cst_16 = arith.constant dense<0.000000e+00> : vector<8x128xf32>
    %19 = tpu.matmul %18, %14, %cst_16 {dimension_numbers = #tpu.dot_dimension_numbers<[1], [0], [0], [1], [0, 0, 1, 1], [], []>} : vector<8x128xf32>, vector<128x128xf32>, vector<8x128xf32> -> vector<8x128xf32>
    %20 = vector.broadcast %15 : vector<1x128xf32> to vector<8x128xf32>
    %21 = arith.addf %19, %20 : vector<8x128xf32>
    %c0_17 = arith.constant 0 : index
    %c0_18 = arith.constant 0 : index
    %22 = vector.load %arg8[%c0_17, %c0_18] : memref<8x128xf32, #tpu.memory_space<vmem>>, vector<8x128xf32>
    tpu.vector_store %arg8[%c0_17, %c0_18], %21 {strides = array<i32>} : memref<8x128xf32, #tpu.memory_space<vmem>>, vector<8x128xf32>,
    return
  }
  func.func @transform_0(%arg0: i32) -> (i32, i32) {
    %c0_i32 = arith.constant 0 : i32
    %c0_i32_0 = arith.constant 0 : i32
    return %arg0, %c0_i32 : i32, i32
  }
  func.func @transform_1(%arg0: i32) -> (i32, i32) {
    %c0_i32 = arith.constant 0 : i32
    %c0_i32_0 = arith.constant 0 : i32
    %c0_i32_1 = arith.constant 0 : i32
    return %c0_i32, %c0_i32_0 : i32, i32
  }
  func.func @transform_2(%arg0: i32) -> (i32, i32) {
    %c0_i32 = arith.constant 0 : i32
    %c0_i32_0 = arith.constant 0 : i32
    %c0_i32_1 = arith.constant 0 : i32
    return %c0_i32, %c0_i32_0 : i32, i32
  }
  func.func @transform_3(%arg0: i32) -> (i32, i32) {
    %c0_i32 = arith.constant 0 : i32
    %c0_i32_0 = arith.constant 0 : i32
    %c0_i32_1 = arith.constant 0 : i32
    return %c0_i32, %c0_i32_0 : i32, i32
  }
  func.func @transform_4(%arg0: i32) -> (i32, i32) {
    %c0_i32 = arith.constant 0 : i32
    %c0_i32_0 = arith.constant 0 : i32
    %c0_i32_1 = arith.constant 0 : i32
    return %c0_i32, %c0_i32_0 : i32, i32
  }
  func.func @transform_5(%arg0: i32) -> (i32, i32) {
    %c0_i32 = arith.constant 0 : i32
    %c0_i32_0 = arith.constant 0 : i32
    %c0_i32_1 = arith.constant 0 : i32
    return %c0_i32, %c0_i32_0 : i32, i32
  }
  func.func @transform_6(%arg0: i32) -> (i32, i32) {
    %c0_i32 = arith.constant 0 : i32
    %c0_i32_0 = arith.constant 0 : i32
    %c0_i32_1 = arith.constant 0 : i32
    return %c0_i32, %c0_i32_0 : i32, i32
  }
  func.func @transform_7(%arg0: i32) -> (i32, i32) {
    %c0_i32 = arith.constant 0 : i32
    %c0_i32_0 = arith.constant 0 : i32
    return %arg0, %c0_i32 : i32, i32
  }
}

</mosaic_0001>

<bundles_post_ra>
// kernel: _nn1_forward_impl.1
= control target key start
LH: loop header
LB: loop body
LE: loop exit
PB: predicated region body
PF: predicated region fallthrough
CT: control target
= control target key end

     0   :  { %12 = vsyncpa [#allocation3], 0  ;;  %s713_s0 = inlined_call_operand.vmem [shape: f32[8,128], index: 0, kind: input, shape index: {}]   ;;  %s714_s1 = inlined_call_operand.hbm [shape: f32[128,128], index: 1, kind: input, shape index: {}]   ;;  %s715_s2 = inlined_call_operand.vmem [shape: f32[1,128], index: 2, kind: input, shape index: {}]   ;;  %s716_s3 = inlined_call_operand.hbm [shape: f32[128,128], index: 3, kind: input, shape index: {}]   ;;  %s717_s4 = inlined_call_operand.vmem [shape: f32[1,128], index: 4, kind: input, shape index: {}]   ;;  %s718_s5 = inlined_call_operand.hbm [shape: f32[128,128], index: 5, kind: input, shape index: {}]   ;;  %s719_s6 = inlined_call_operand.vmem [shape: f32[1,128], index: 6, kind: input, shape index: {}]   ;;  %s720_s7 = inlined_call_operand.vmem [shape: f32[8,128], index: 7, kind: output, shape index: {}]  }
   0x1   :  { %13 = vsyncpa [#allocation5], 0  ;;  %s588_s24 = smov [#allocation4]   ;;  %s589_s26 = smov [#allocation2]  }
   0x2   :  { %s35_s25 = sshll.u32 %s588_s24, 4  ;;  %s21_s27 = sshll.u32 %s589_s26, 4  ;;  %s36_s25 = int_to_ptr.vmem [resolvable:$true] %s35_s25  ;;  %s22_s27 = int_to_ptr.vmem [resolvable:$true] %s21_s27 }
   0x3   :  { %s532_s28 = scalar_lea.vmem %s36_s25, 2048  ;;  %p537_p1 = scmp.lt.s32.totalorder %s36_s25, %s36_s25 }
   0x4   :  { %p533_p0 = scmp.ne.s32.totalorder %s36_s25, %s532_s28  ;;  %p538_p2 = scmp.lt.s32.totalorder %s532_s28, %s532_s28 }
   0x6   :  { %p539_p3 = por %p538_p2, %p537_p1 }
   0x8   :  { %p540_p4 = pnand %p539_p3, %p533_p0 }
   0xa   :  { %543 = shalt.err (!%p540_p4)
}
   0xb   :  { %s590_s29 = smov 128   ;;  %s591_s30 = smov 8  }
   0xc   :  { %41 = dma.hbm_to_vmem [thread:$0]  %s716_s3, 2048, %s36_s25, [#allocation5], %s590_s29, %s590_s29, %s591_s30  }
   0xd   :  { %s552_s10 = scalar_lea.vmem %s22_s27, 2048  ;;  %p557_p6 = scmp.lt.s32.totalorder %s22_s27, %s22_s27 }
   0xe   :  { %p553_p5 = scmp.ne.s32.totalorder %s22_s27, %s552_s10  ;;  %p558_p7 = scmp.lt.s32.totalorder %s552_s10, %s552_s10 }
  0x10   :  { %p559_p8 = por %p558_p7, %p557_p6 }
  0x12   :  { %p560_p9 = pnand %p559_p8, %p553_p5 }
  0x14   :  { %563 = shalt.err (!%p560_p9)
}
  0x15   :  { %27 = dma.hbm_to_vmem [thread:$0]  %s714_s1, 2048, %s22_s27, [#allocation3], %s590_s29, %s590_s29, %s591_s30  }
  0x16   :  { %s592_s13 = smov [#allocation6]  }
  0x17   :  { %s49_s14 = sshll.u32 %s592_s13, 4  ;;  %s50_s14 = int_to_ptr.vmem [resolvable:$true] %s49_s14 }
  0x18   :  { %s572_s15 = scalar_lea.vmem %s50_s14, 2048  ;;  %p577_p11 = scmp.lt.s32.totalorder %s50_s14, %s50_s14 }
  0x19   :  { %p573_p10 = scmp.ne.s32.totalorder %s50_s14, %s572_s15  ;;  %p578_p12 = scmp.lt.s32.totalorder %s572_s15, %s572_s15 }
  0x1b   :  { %p579_p13 = por %p578_p12, %p577_p11 }
  0x1d   :  { %p580_p0 = pnand %p579_p13, %p573_p10 }
  0x1f   :  { %583 = shalt.err (!%p580_p0)
}
  0x20   :  { %55 = dma.hbm_to_vmem [thread:$0]  %s718_s5, 2048, %s50_s14, [#allocation5], %s590_s29, %s590_s29, %s591_s30  }
  0x21   :  { %584 = dma.done.wait [#allocation3], 2048  }
  0x22   :  { %585 = vsyncadd [#allocation3], 4294965248 }
  0x23   :  { %586 = dma.done.wait [#allocation5], 4096  }
  0x24   :  { %587 = vsyncadd [#allocation5], 4294963200  ;;  %v593_v0 = vmov 0.0   ;;  %vm594_vm0 = vmmov 0   ;;  %v83_v1 = vld [vmem:[#allocation2 + $0x78] sm:$0xff]  ;;  %v82_v2 = vld [vmem:[#allocation2 + $0x70] sm:$0xff] }
  0x25   :  { %412 = vmatprep.subr.mxu0 %v593_v0  ;;  %444 = vmatprep.mubr.msk.f32.mxu0 %vm594_vm0, %v593_v0  ;;  %v81_v3 = vld [vmem:[#allocation2 + $0x68] sm:$0xff]  ;;  %v80_v4 = vld [vmem:[#allocation2 + $0x60] sm:$0xff]  ;;  %v176_v5 = vld [vmem:[#allocation4 + $0x78] sm:$0xff] }
  0x26   :  { %447 = vmatprep.subr.mxu1 %v593_v0  ;;  %479 = vmatprep.mubr.msk.f32.mxu1 %vm594_vm0, %v593_v0  ;;  %v79_v6 = vld [vmem:[#allocation2 + $0x58] sm:$0xff]  ;;  %v175_v7 = vld [vmem:[#allocation4 + $0x70] sm:$0xff]  ;;  %v174_v8 = vld [vmem:[#allocation4 + $0x68] sm:$0xff] }
  0x27   :  { %413 = vmatpush3.msra.mxu0 %v83_v1  ;;  %448 = vmatpush3.msra.mxu1 %v176_v5  ;;  %v78_v9 = vld [vmem:[#allocation2 + $0x50] sm:$0xff]  ;;  %v173_v10 = vld [vmem:[#allocation4 + $0x60] sm:$0xff]  ;;  %v77_v11 = vld [vmem:[#allocation2 + $0x48] sm:$0xff] }
  0x28   :  { %414 = vmatprep.subr.mxu0 %v593_v0  ;;  %449 = vmatprep.subr.mxu1 %v593_v0  ;;  %v172_v12 = vld [vmem:[#allocation4 + $0x58] sm:$0xff]  ;;  %v76_v13 = vld [vmem:[#allocation2 + $0x40] sm:$0xff]  ;;  %v171_v14 = vld [vmem:[#allocation4 + $0x50] sm:$0xff] }
  0x29   :  { %415 = vmatpush3.msra.mxu0 %v82_v2  ;;  %450 = vmatpush3.msra.mxu1 %v175_v7  ;;  %v75_v15 = vld [vmem:[#allocation2 + $0x38] sm:$0xff]  ;;  %v170_v16 = vld [vmem:[#allocation4 + $0x48] sm:$0xff]  ;;  %v74_v17 = vld [vmem:[#allocation2 + $0x30] sm:$0xff] }
  0x2a   :  { %416 = vmatprep.subr.mxu0 %v593_v0  ;;  %451 = vmatprep.subr.mxu1 %v593_v0  ;;  %v169_v18 = vld [vmem:[#allocation4 + $0x40] sm:$0xff]  ;;  %v73_v19 = vld [vmem:[#allocation2 + $0x28] sm:$0xff]  ;;  %v168_v20 = vld [vmem:[#allocation4 + $0x38] sm:$0xff] }
  0x2b   :  { %417 = vmatpush3.msra.mxu0 %v81_v3  ;;  %452 = vmatpush3.msra.mxu1 %v174_v8  ;;  %v72_v21 = vld [vmem:[#allocation2 + $0x20] sm:$0xff]  ;;  %v167_v22 = vld [vmem:[#allocation4 + $0x30] sm:$0xff]  ;;  %v71_v23 = vld [vmem:[#allocation2 + $0x18] sm:$0xff] }
  0x2c   :  { %418 = vmatprep.subr.mxu0 %v593_v0  ;;  %453 = vmatprep.subr.mxu1 %v593_v0  ;;  %v166_v24 = vld [vmem:[#allocation4 + $0x28] sm:$0xff]  ;;  %v70_v25 = vld [vmem:[#allocation2 + $0x10] sm:$0xff]  ;;  %v165_v26 = vld [vmem:[#allocation4 + $0x20] sm:$0xff] }
  0x2d   :  { %419 = vmatpush3.msra.mxu0 %v80_v4  ;;  %454 = vmatpush3.msra.mxu1 %v173_v10  ;;  %v69_v27 = vld [vmem:[#allocation2 + $0x8] sm:$0xff]  ;;  %v68_v28 = vld [vmem:[#allocation2] sm:$0xff]  ;;  %v164_v30 = vld [vmem:[#allocation4 + $0x18] sm:$0xff] }
  0x2e   :  { %420 = vmatprep.subr.mxu0 %v593_v0  ;;  %455 = vmatprep.subr.mxu1 %v593_v0  ;;  %v67_v29 = vld [vmem:[%s713_s0] sm:$0xff]  ;;  %v163_v31 = vld [vmem:[#allocation4 + $0x10] sm:$0xff]  ;;  %v162_v32 = vld [vmem:[#allocation4 + $0x8] sm:$0xff] }
  0x2f   :  { %421 = vmatpush3.msra.mxu0 %v79_v6  ;;  %456 = vmatpush3.msra.mxu1 %v172_v12  ;;  %v161_v33 = vld [vmem:[#allocation4] sm:$0xff]  ;;  %v271_v34 = vld [vmem:[#allocation6 + $0x78] sm:$0xff]  ;;  %v270_v35 = vld [vmem:[#allocation6 + $0x70] sm:$0xff] }
  0x30   :  { %422 = vmatprep.subr.mxu0 %v593_v0  ;;  %457 = vmatprep.subr.mxu1 %v593_v0  ;;  %v269_v36 = vld [vmem:[#allocation6 + $0x68] sm:$0xff]  ;;  %v268_v37 = vld [vmem:[#allocation6 + $0x60] sm:$0xff]  ;;  %v267_v38 = vld [vmem:[#allocation6 + $0x58] sm:$0xff] }
  0x31   :  { %423 = vmatpush3.msra.mxu0 %v78_v9  ;;  %458 = vmatpush3.msra.mxu1 %v171_v14  ;;  %v266_v39 = vld [vmem:[#allocation6 + $0x50] sm:$0xff]  ;;  %v265_v40 = vld [vmem:[#allocation6 + $0x48] sm:$0xff]  ;;  %v264_v41 = vld [vmem:[#allocation6 + $0x40] sm:$0xff] }
  0x32   :  { %424 = vmatprep.subr.mxu0 %v593_v0  ;;  %459 = vmatprep.subr.mxu1 %v593_v0  ;;  %v263_v42 = vld [vmem:[#allocation6 + $0x38] sm:$0xff]  ;;  %v262_v43 = vld [vmem:[#allocation6 + $0x30] sm:$0xff]  ;;  %v261_v44 = vld [vmem:[#allocation6 + $0x28] sm:$0xff] }
  0x33   :  { %425 = vmatpush3.msra.mxu0 %v77_v11  ;;  %460 = vmatpush3.msra.mxu1 %v170_v16  ;;  %v260_v45 = vld [vmem:[#allocation6 + $0x20] sm:$0xff]  ;;  %v259_v52 = vld [vmem:[#allocation6 + $0x18] sm:$0xff]  ;;  %v258_v53 = vld [vmem:[#allocation6 + $0x10] sm:$0xff] }
  0x34   :  { %426 = vmatprep.subr.mxu0 %v593_v0  ;;  %461 = vmatprep.subr.mxu1 %v593_v0  ;;  %v358_v46 = vld [vmem:[%s715_s2] ss:$0 sm:$0xff]  ;;  %v257_v54 = vld [vmem:[#allocation6 + $0x8] sm:$0xff] }
  0x35   :  { %427 = vmatpush3.msra.mxu0 %v76_v13  ;;  %462 = vmatpush3.msra.mxu1 %v169_v18  ;;  %v256_v55 = vld [vmem:[#allocation6] sm:$0xff] }
  0x36   :  { %428 = vmatprep.subr.mxu0 %v593_v0  ;;  %463 = vmatprep.subr.mxu1 %v593_v0  ;;  %v359_v56 = vld [vmem:[%s717_s4] ss:$0 sm:$0xff] }
  0x37   :  { %429 = vmatpush3.msra.mxu0 %v75_v15  ;;  %464 = vmatpush3.msra.mxu1 %v168_v20  ;;  %v360_v62 = vld [vmem:[%s719_s6] ss:$0 sm:$0xff] }
  0x38   :  { %430 = vmatprep.subr.mxu0 %v593_v0  ;;  %465 = vmatprep.subr.mxu1 %v593_v0 }
  0x39   :  { %431 = vmatpush3.msra.mxu0 %v74_v17  ;;  %466 = vmatpush3.msra.mxu1 %v167_v22 }
  0x3a   :  { %432 = vmatprep.subr.mxu0 %v593_v0  ;;  %467 = vmatprep.subr.mxu1 %v593_v0 }
  0x3b   :  { %433 = vmatpush3.msra.mxu0 %v73_v19  ;;  %468 = vmatpush3.msra.mxu1 %v166_v24 }
  0x3c   :  { %434 = vmatprep.subr.mxu0 %v593_v0  ;;  %469 = vmatprep.subr.mxu1 %v593_v0 }
  0x3d   :  { %435 = vmatpush3.msra.mxu0 %v72_v21  ;;  %470 = vmatpush3.msra.mxu1 %v165_v26 }
  0x3e   :  { %436 = vmatprep.subr.mxu0 %v593_v0  ;;  %471 = vmatprep.subr.mxu1 %v593_v0 }
  0x3f   :  { %437 = vmatpush3.msra.mxu0 %v71_v23  ;;  %472 = vmatpush3.msra.mxu1 %v164_v30 }
  0x40   :  { %438 = vmatprep.subr.mxu0 %v593_v0  ;;  %473 = vmatprep.subr.mxu1 %v593_v0 }
  0x41   :  { %439 = vmatpush3.msra.mxu0 %v70_v25  ;;  %474 = vmatpush3.msra.mxu1 %v163_v31 }
  0x42   :  { %440 = vmatprep.subr.mxu0 %v593_v0  ;;  %475 = vmatprep.subr.mxu1 %v593_v0 }
  0x43   :  { %441 = vmatpush3.msra.mxu0 %v69_v27  ;;  %476 = vmatpush3.msra.mxu1 %v162_v32 }
  0x44   :  { %442 = vmatprep.subr.mxu0 %v593_v0  ;;  %477 = vmatprep.subr.mxu1 %v593_v0 }
  0x45   :  { %443 = vmatpush3.msra.mxu0 %v68_v28  ;;  %478 = vmatpush3.msra.mxu1 %v161_v33 }
  0x46   :  { %445 = vmatmul.mubr.f32.vlgmr.msra.gmra.mxu0 %v67_v29  ;;  %482 = vmatprep.subr.mxu0 %v593_v0 }
  0x47   :  { %514 = vmatprep.mubr.msk.f32.mxu0 %vm594_vm0, %v593_v0  ;;  %483 = vmatpush3.msra.mxu0 %v271_v34 }
  0x48   :  { %484 = vmatprep.subr.mxu0 %v593_v0 }
  0x49   :  { %485 = vmatpush3.msra.mxu0 %v270_v35 }
  0x4a   :  { %486 = vmatprep.subr.mxu0 %v593_v0 }
  0x4b   :  { %487 = vmatpush3.msra.mxu0 %v269_v36 }
  0x4c   :  { %488 = vmatprep.subr.mxu0 %v593_v0 }
  0x4d   :  { %489 = vmatpush3.msra.mxu0 %v268_v37 }
  0x4e   :  { %490 = vmatprep.subr.mxu0 %v593_v0 }
  0x4f   :  { %491 = vmatpush3.msra.mxu0 %v267_v38 }
  0x50   :  { %492 = vmatprep.subr.mxu0 %v593_v0 }
  0x51   :  { %493 = vmatpush3.msra.mxu0 %v266_v39 }
  0x52   :  { %494 = vmatprep.subr.mxu0 %v593_v0 }
  0x53   :  { %495 = vmatpush3.msra.mxu0 %v265_v40 }
  0x54   :  { %496 = vmatprep.subr.mxu0 %v593_v0 }
  0x55   :  { %497 = vmatpush3.msra.mxu0 %v264_v41 }
  0x56   :  { %498 = vmatprep.subr.mxu0 %v593_v0 }
  0x57   :  { %499 = vmatpush3.msra.mxu0 %v263_v42 }
  0x58   :  { %500 = vmatprep.subr.mxu0 %v593_v0 }
  0x59   :  { %501 = vmatpush3.msra.mxu0 %v262_v43 }
  0x5a   :  { %502 = vmatprep.subr.mxu0 %v593_v0 }
  0x5b   :  { %503 = vmatpush3.msra.mxu0 %v261_v44 }
  0x5c   :  { %504 = vmatprep.subr.mxu0 %v593_v0 }
  0x5d   :  { %505 = vmatpush3.msra.mxu0 %v260_v45 }
  0x5e   :  { %506 = vmatprep.subr.mxu0 %v593_v0 }
  0x5f   :  { %507 = vmatpush3.msra.mxu0 %v259_v52 }
  0x60   :  { %508 = vmatprep.subr.mxu0 %v593_v0 }
  0x61   :  { %509 = vmatpush3.msra.mxu0 %v258_v53 }
  0x62   :  { %510 = vmatprep.subr.mxu0 %v593_v0 }
  0x63   :  { %511 = vmatpush3.msra.mxu0 %v257_v54 }
  0x64   :  { %512 = vmatprep.subr.mxu0 %v593_v0 }
  0x65   :  { %513 = vmatpush3.msra.mxu0 %v256_v55 }
 0x106   :  { %v157_v47 = vpop.f32.mrf.mxu0 }
 0x107   :  { %v158_v48 = vadd.f32 %v358_v46, %v157_v47 }
 0x108   :  { %v446_v49 = vpop.f32.mrf.mxu0 }
 0x109   :  { %v178_v50 = vmul.f32 0.01, %v158_v48 }
 0x10b   :  { %v179_v51 = vmax.f32 %v158_v48, %v178_v50 }
 0x10d   :  { %480 = vmatmul.mubr.f32.vlgmr.msra.gmra.mxu1 %v179_v51 }
 0x1cd   :  { %v252_v57 = vpop.f32.mrf.mxu1 }
 0x1ce   :  { %v253_v58 = vadd.f32 %v359_v56, %v252_v57 }
 0x1cf   :  { %v481_v59 = vpop.f32.mrf.mxu1 }
 0x1d0   :  { %v273_v60 = vmul.f32 0.01, %v253_v58 }
 0x1d2   :  { %v274_v61 = vmax.f32 %v253_v58, %v273_v60 }
 0x1d4   :  { %515 = vmatmul.mubr.f32.vlgmr.msra.gmra.mxu0 %v274_v61 }
 0x294   :  { %v347_v63 = vpop.f32.mrf.mxu0 }
 0x295   :  { %v348_v1 = vadd.f32 %v360_v62, %v347_v63 }
 0x296   :  { %v516_v2 = vpop.f32.mrf.mxu0 }
 0x297   :  { %351 = vst [vmem:[%s720_s7] sm:$0xff] %v348_v1 }
 0x298   :  { %356 = vsyncpa [#allocation3], 1 }
 0x299   :  { %357 = vsyncpa [#allocation5], 1 }

</bundles_post_ra>
